<compile_context>
chip_gen: v5e
topology: v5e:2x2
jax: 0.10.0
libtpu: 0.0.40
codegen_flags: <defaults>
</compile_context>

<pallas_src>
import numpy as np
import jax
import jax.numpy as jnp
from jax.experimental import pallas as pl
from jax.experimental.pallas import tpu as pltpu


# ----------------------------------------------------------------------------
# Host-side helpers (vectorized over all cutouts).
# ----------------------------------------------------------------------------
def _bilinear_matrices(offsets, sizes, out_size, full_len):
    """(n, out_size, full_len) f32 matrices; matrix i crops
    [offsets[i], offsets[i]+sizes[i]) and bilinearly resizes it to out_size
    (align_corners=False).  Fully vectorized over the n cutouts."""
    offsets = offsets.astype(np.int64)
    sizes = sizes.astype(np.int64)
    n = offsets.shape[0]
    idx = np.arange(out_size)[None, :]                               # (1, cs)
    off = offsets[:, None].astype(np.float64)
    sz = sizes[:, None].astype(np.float64)
    src = off + (idx + 0.5) * (sz / out_size) - 0.5
    src = np.clip(src, off, off + sz - 1)
    i0 = np.floor(src).astype(np.int64)
    i0 = np.clip(i0, offsets[:, None],
                 (offsets + np.maximum(sizes - 2, 0))[:, None])
    frac = (src - i0).astype(np.float32)
    i1 = np.minimum(i0 + 1, (offsets + sizes - 1)[:, None])
    Wm = np.zeros((n, out_size, full_len), np.float32)
    rows = np.broadcast_to(np.arange(n)[:, None], (n, out_size))
    cols = np.broadcast_to(idx, (n, out_size))
    np.add.at(Wm, (rows, cols, i0), 1.0 - frac)
    np.add.at(Wm, (rows, cols, i1), frac)
    return Wm


def _block_diag_cols(wxT, C):
    """(n, W, cs) per-cutout column-interp matrices -> (n, C*W, C*cs)
    block-diagonal form, so the column resample of all channels is ONE
    lane-contiguous MXU matmul per cutout."""
    n, W, cs = wxT.shape
    out = np.zeros((n, C * W, C * cs), wxT.dtype)
    for c in range(C):
        out[:, c * W:(c + 1) * W, c * cs:(c + 1) * cs] = wxT
    return out


def _vmem_capacity_bytes():
    """Physical VMEM of the local chip; conservative v7x fallback if the query
    is unavailable (e.g. interpret mode on CPU)."""
    try:
        info = pltpu.get_tpu_info()
        cap = getattr(info, "vmem_capacity_bytes", None)
        if cap:
            return int(cap)
    except Exception:
        pass
    return 64 << 20


def _step_vmem_bytes(nb, cs, H, W, C):
    """Per-grid-step VMEM footprint, INCLUDING in-kernel temporaries
    (f32 row-resample result, per-cutout bf16 row + f32 result tile)."""
    CW, Ccs = C * W, C * cs
    bf, f32 = 2, 4
    x_res = 2 * H * CW * bf                  # resident input (pipeline buffers)
    wy_blk = 2 * nb * cs * H * bf
    wx_blk = 2 * nb * CW * Ccs * bf          # block-diagonal column weights
    nz_blk = 2 * nb * cs * Ccs * f32         # host noise stream
    out_blk = 2 * nb * cs * Ccs * f32
    tmp = nb * cs * CW * f32                 # in-kernel f32 (nb*cs, C*W)
    scratch = cs * CW * bf + 2 * cs * Ccs * f32
    return x_res + wy_blk + wx_blk + nz_blk + out_blk + tmp + scratch


def _pick_nb(cutn, cs, H, W, C, budget_bytes):
    """Largest divisor of cutn whose per-step footprint fits the VMEM budget.
    Bigger nb => fewer grid steps (~0.35us each) and a taller M = nb*cs row
    matmul (v6e/v7x MXU is 256-wide).  No forced multi-step constraint."""
    best = 1
    for d in range(1, cutn + 1):
        if cutn % d == 0 and _step_vmem_bytes(d, cs, H, W, C) <= budget_bytes:
            best = d
    return best


# ----------------------------------------------------------------------------
# Kernel.
# ----------------------------------------------------------------------------
def _cutout_kernel(facs_ref, x_ref, wy_ref, wxbd_ref, noise_ref, o_ref):
    nb, cs, H = wy_ref.shape          # wy block:   (nb, cs, H)
    step = pl.program_id(0)

    x = x_ref[...]                                       # (H, C*W) bf16, resident
    wy = wy_ref[...].reshape(nb * cs, H)                 # (nb*cs, H) bf16

    # Row resample fattened over channels AND cutouts: one big MXU matmul.
    tmp = jnp.dot(wy, x, preferred_element_type=jnp.float32)   # (nb*cs, C*W) f32

    for b in range(nb):                                  # static unroll (nb small)
        fac = facs_ref[step * nb + b]                    # f32 scalar from SMEM
        # Cast per cutout: f32 and bf16 copies of `tmp` are never both live.
        row = tmp[b * cs:(b + 1) * cs, :].astype(jnp.bfloat16)        # (cs, C*W)
        # Column resample of ALL channels in one MXU pass via the per-cutout
        # block-diagonal interpolation matrix; result is lane-contiguous.
        res = jnp.dot(row, wxbd_ref[b],
                      preferred_element_type=jnp.float32)             # (cs, C*cs)
        # ONE lane-dense store per cutout (noise added in a single expression).
        o_ref[b] = res + fac * noise_ref[b]


def make_cutouts_pallas(x_hcw, wy, wxbd, facs, noise, nb, vmem_limit_bytes):
    H, CW = x_hcw.shape
    cutn, cs, _ = wy.shape
    Ccs = wxbd.shape[2]
    assert cutn % nb == 0
    n_steps = cutn // nb

    return pl.pallas_call(
        _cutout_kernel,
        out_shape=jax.ShapeDtypeStruct((cutn, cs, Ccs), jnp.float32),
        grid=(n_steps,),
        in_specs=[
            pl.BlockSpec(memory_space=pltpu.MemorySpace.SMEM),   # facs (cutn,) f32
            pl.BlockSpec((H, CW), lambda n: (0, 0)),             # x, resident in VMEM
            pl.BlockSpec((nb, cs, H), lambda n: (n, 0, 0)),      # wy
            pl.BlockSpec((nb, CW, Ccs), lambda n: (n, 0, 0)),    # block-diag wxT
            pl.BlockSpec((nb, cs, Ccs), lambda n: (n, 0, 0)),    # noise
        ],
        out_specs=pl.BlockSpec((nb, cs, Ccs), lambda n: (n, 0, 0)),
        compiler_params=pltpu.CompilerParams(
            dimension_semantics=("parallel",),
            vmem_limit_bytes=int(vmem_limit_bytes)),
    )(facs, x_hcw, wy, wxbd, noise)


# ----------------------------------------------------------------------------
# Module wrapper.
# ----------------------------------------------------------------------------
class MakeCutoutsPallas:
    """JAX/Pallas port of MakeCutouts (augmentations omitted, see TODOs)."""

    def __init__(self, cut_size, cutn, cut_pow=1.0, noise_fac=0.1):
        self.cut_size = cut_size
        self.cutn = cutn
        self.cut_pow = cut_pow
        self.noise_fac = noise_fac

    def __call__(self, x, key):
        # x: (N, C, H, W); like the PyTorch module's noise broadcast, N must be 1.
        N, C, H, W = x.shape
        assert N == 1, "facs broadcast in the reference module requires N == 1"
        cs, cutn = self.cut_size, self.cutn
        max_size = min(W, H)
        min_size = min(W, H, cs)

        k_geo, k_noise, k_facs = jax.random.split(key, 3)

        # One batched draw + one host transfer for ALL cutout geometry;
        # interpolation matrices built with fully vectorized numpy.
        u = np.asarray(jax.random.uniform(k_geo, (3, cutn), jnp.float32),
                       dtype=np.float64)
        sizes = (u[0] ** self.cut_pow * (max_size - min_size)
                 + min_size).astype(np.int64)
        offs_x = np.floor(u[1] * (W - sizes + 1)).astype(np.int64)
        offs_y = np.floor(u[2] * (H - sizes + 1)).astype(np.int64)

        wy_np = _bilinear_matrices(offs_y, sizes, cs, H)       # (cutn, cs, H)
        wx_np = _bilinear_matrices(offs_x, sizes, cs, W)       # (cutn, cs, W)
        wxT_np = np.transpose(wx_np, (0, 2, 1))                # (cutn, W, cs)
        wxbd_np = _block_diag_cols(wxT_np, C)                  # (cutn, C*W, C*cs)
        self._last_wy, self._last_wxT = wy_np, wxT_np          # kept for testing

        nf = float(self.noise_fac) if self.noise_fac else 0.0
        facs = jax.random.uniform(k_facs, (cutn,), jnp.float32,
                                  minval=0.0, maxval=nf)
        # Host-generated iid normal noise at the kernel's lane-dense layout.
        noise = jax.random.normal(k_noise, (cutn, cs, C * cs), jnp.float32)

        # bf16 operands; channels packed along lanes: x_hcw[h, c*W + w] = x[0,c,h,w]
        x_hcw = jnp.transpose(x[0].astype(jnp.bfloat16), (1, 0, 2)).reshape(H, C * W)
        wy = jnp.asarray(wy_np, jnp.bfloat16)
        wxbd = jnp.asarray(wxbd_np, jnp.bfloat16)

        cap = _vmem_capacity_bytes()
        nb = _pick_nb(cutn, cs, H, W, C, budget_bytes=int(0.7 * cap))
        need = _step_vmem_bytes(nb, cs, H, W, C)
        vmem_limit = int(min(max(need + (8 << 20), 16 << 20), int(0.9 * cap)))

        out = make_cutouts_pallas(x_hcw, wy, wxbd, facs, noise, nb, vmem_limit)
        # (cutn, cs, C*cs) -> (cutn, C, cs, cs); torch.cat(cutouts, 0) with N==1.
        out = jnp.transpose(out.reshape(cutn, cs, C, cs), (0, 2, 1, 3))
        return out.reshape(cutn * N, C, cs, cs)


if __name__ == "__main__":
    key = jax.random.PRNGKey(0)
    k_in, k_fwd, k_fwd2 = jax.random.split(key, 3)

    N, C, H, W = 1, 4, 32, 32
    cut_size, cutn = 16, 4

    x = jax.random.uniform(k_in, (N, C, H, W), jnp.float32)

    # 1) Full module (with noise), largest-nb path (single grid step).
    mod = MakeCutoutsPallas(cut_size=cut_size, cutn=cutn, cut_pow=1.0)
    out = jax.block_until_ready(mod(x, k_fwd))
    assert out.shape == (cutn * N, C, cut_size, cut_size), out.shape
    assert out.dtype == jnp.float32
    assert bool(jnp.all(jnp.isfinite(out)))

    # 2) Noise-free module vs. a float64 numpy bilinear-resample reference
    #    (cutn=3 exercises a different nb / geometry).
    mod0 = MakeCutoutsPallas(cut_size=cut_size, cutn=3, cut_pow=1.0, noise_fac=0.0)
    out0 = np.asarray(jax.block_until_ready(mod0(x, k_fwd2)))
    x_np = np.asarray(x[0], np.float64)
    ref = np.einsum('nih,chw,nwj->ncij',
                    mod0._last_wy.astype(np.float64), x_np,
                    mod0._last_wxT.astype(np.float64))
    err = float(np.max(np.abs(out0 - ref)))
    assert err < 5e-2, f"max abs error {err}"

    print("KERNEL_OK")
</pallas_src>

<mosaic_0001>
module attributes {stable_mosaic.version = 11 : i64} {
  func.func @_cutout_kernel(%arg0: i32, %arg1: memref<4xf32, #tpu.memory_space<smem>>, %arg2: memref<32x128xbf16, #tpu.memory_space<vmem>>, %arg3: memref<4x16x32xbf16, #tpu.memory_space<vmem>>, %arg4: memref<4x128x64xbf16, #tpu.memory_space<vmem>>, %arg5: memref<4x16x64xf32, #tpu.memory_space<vmem>>, %arg6: memref<4x16x64xf32, #tpu.memory_space<vmem>>) attributes {dimension_semantics = [#tpu.dimension_semantics<parallel>], iteration_bounds = array<i64: 1>, scalar_prefetch = 0 : i64, scratch_operands = 0 : i64, tpu.core_type = #tpu.core_type<tc>, window_params = [{transform_indices = @transform_0, window_bounds = array<i64: 4>}, {pipeline_mode = #tpu.pipeline_mode<synchronous>, transform_indices = @transform_1, window_bounds = array<i64: 32, 128>}, {transform_indices = @transform_2, window_bounds = array<i64: 4, 16, 32>}, {transform_indices = @transform_3, window_bounds = array<i64: 4, 128, 64>}, {transform_indices = @transform_4, window_bounds = array<i64: 4, 16, 64>}, {transform_indices = @transform_5, window_bounds = array<i64: 4, 16, 64>}]} {
    %c0 = arith.constant 0 : index
    %c0_0 = arith.constant 0 : index
    %0 = vector.load %arg2[%c0, %c0_0] : memref<32x128xbf16, #tpu.memory_space<vmem>>, vector<32x128xbf16>
    %c0_1 = arith.constant 0 : index
    %c0_2 = arith.constant 0 : index
    %c0_3 = arith.constant 0 : index
    %1 = vector.load %arg3[%c0_1, %c0_2, %c0_3] : memref<4x16x32xbf16, #tpu.memory_space<vmem>>, vector<4x16x32xbf16>
    %2 = vector.shape_cast %1 : vector<4x16x32xbf16> to vector<64x32xbf16>
    %cst = arith.constant dense<0.000000e+00> : vector<64x128xf32>
    %3 = tpu.matmul %2, %0, %cst {dimension_numbers = #tpu.dot_dimension_numbers<[1], [0], [0], [1], [0, 0, 1, 1], [], []>} : vector<64x32xbf16>, vector<32x128xbf16>, vector<64x128xf32> -> vector<64x128xf32>
    %c4_i32 = arith.constant 4 : i32
    %4 = arith.muli %arg0, %c4_i32 : i32
    %c0_i32 = arith.constant 0 : i32
    %5 = arith.addi %4, %c0_i32 : i32
    %6 = arith.index_cast %5 : i32 to index
    %7 = memref.load %arg1[%6] : memref<4xf32, #tpu.memory_space<smem>>
    %8 = vector.extract_strided_slice %3 {offsets = [0, 0], sizes = [16, 128], strides = [1, 1]} : vector<64x128xf32> to vector<16x128xf32>
    %9 = arith.truncf %8 : vector<16x128xf32> to vector<16x128xbf16>
    %c0_4 = arith.constant 0 : index
    %c0_5 = arith.constant 0 : index
    %c0_6 = arith.constant 0 : index
    %10 = vector.load %arg4[%c0_4, %c0_5, %c0_6] : memref<4x128x64xbf16, #tpu.memory_space<vmem>>, vector<1x128x64xbf16>
    %11 = vector.shape_cast %10 : vector<1x128x64xbf16> to vector<128x64xbf16>
    %cst_7 = arith.constant dense<0.000000e+00> : vector<16x64xf32>
    %12 = tpu.matmul %9, %11, %cst_7 {dimension_numbers = #tpu.dot_dimension_numbers<[1], [0], [0], [1], [0, 0, 1, 1], [], []>} : vector<16x128xbf16>, vector<128x64xbf16>, vector<16x64xf32> -> vector<16x64xf32>
    %c0_8 = arith.constant 0 : index
    %c0_9 = arith.constant 0 : index
    %c0_10 = arith.constant 0 : index
    %13 = vector.load %arg5[%c0_8, %c0_9, %c0_10] : memref<4x16x64xf32, #tpu.memory_space<vmem>>, vector<1x16x64xf32>
    %14 = vector.shape_cast %13 : vector<1x16x64xf32> to vector<16x64xf32>
    %15 = vector.broadcast %7 : f32 to vector<16x64xf32>
    %16 = arith.mulf %15, %14 : vector<16x64xf32>
    %17 = arith.addf %12, %16 : vector<16x64xf32>
    %c0_11 = arith.constant 0 : index
    %c0_12 = arith.constant 0 : index
    %c0_13 = arith.constant 0 : index
    %18 = vector.load %arg6[%c0_11, %c0_12, %c0_13] : memref<4x16x64xf32, #tpu.memory_space<vmem>>, vector<1x16x64xf32>
    %19 = vector.shape_cast %18 : vector<1x16x64xf32> to vector<16x64xf32>
    %20 = vector.shape_cast %17 : vector<16x64xf32> to vector<1x16x64xf32>
    tpu.vector_store %arg6[%c0_11, %c0_12, %c0_13], %20 {strides = array<i32>} : memref<4x16x64xf32, #tpu.memory_space<vmem>>, vector<1x16x64xf32>,
    %c4_i32_14 = arith.constant 4 : i32
    %21 = arith.muli %arg0, %c4_i32_14 : i32
    %c1_i32 = arith.constant 1 : i32
    %22 = arith.addi %21, %c1_i32 : i32
    %23 = arith.index_cast %22 : i32 to index
    %24 = memref.load %arg1[%23] : memref<4xf32, #tpu.memory_space<smem>>
    %25 = vector.extract_strided_slice %3 {offsets = [16, 0], sizes = [16, 128], strides = [1, 1]} : vector<64x128xf32> to vector<16x128xf32>
    %26 = arith.truncf %25 : vector<16x128xf32> to vector<16x128xbf16>
    %c1 = arith.constant 1 : index
    %c0_15 = arith.constant 0 : index
    %c0_16 = arith.constant 0 : index
    %27 = vector.load %arg4[%c1, %c0_15, %c0_16] : memref<4x128x64xbf16, #tpu.memory_space<vmem>>, vector<1x128x64xbf16>
    %28 = vector.shape_cast %27 : vector<1x128x64xbf16> to vector<128x64xbf16>
    %cst_17 = arith.constant dense<0.000000e+00> : vector<16x64xf32>
    %29 = tpu.matmul %26, %28, %cst_17 {dimension_numbers = #tpu.dot_dimension_numbers<[1], [0], [0], [1], [0, 0, 1, 1], [], []>} : vector<16x128xbf16>, vector<128x64xbf16>, vector<16x64xf32> -> vector<16x64xf32>
    %c1_18 = arith.constant 1 : index
    %c0_19 = arith.constant 0 : index
    %c0_20 = arith.constant 0 : index
    %30 = vector.load %arg5[%c1_18, %c0_19, %c0_20] : memref<4x16x64xf32, #tpu.memory_space<vmem>>, vector<1x16x64xf32>
    %31 = vector.shape_cast %30 : vector<1x16x64xf32> to vector<16x64xf32>
    %32 = vector.broadcast %24 : f32 to vector<16x64xf32>
    %33 = arith.mulf %32, %31 : vector<16x64xf32>
    %34 = arith.addf %29, %33 : vector<16x64xf32>
    %c1_21 = arith.constant 1 : index
    %c0_22 = arith.constant 0 : index
    %c0_23 = arith.constant 0 : index
    %35 = vector.load %arg6[%c1_21, %c0_22, %c0_23] : memref<4x16x64xf32, #tpu.memory_space<vmem>>, vector<1x16x64xf32>
    %36 = vector.shape_cast %35 : vector<1x16x64xf32> to vector<16x64xf32>
    %37 = vector.shape_cast %34 : vector<16x64xf32> to vector<1x16x64xf32>
    tpu.vector_store %arg6[%c1_21, %c0_22, %c0_23], %37 {strides = array<i32>} : memref<4x16x64xf32, #tpu.memory_space<vmem>>, vector<1x16x64xf32>,
    %c4_i32_24 = arith.constant 4 : i32
    %38 = arith.muli %arg0, %c4_i32_24 : i32
    %c2_i32 = arith.constant 2 : i32
    %39 = arith.addi %38, %c2_i32 : i32
    %40 = arith.index_cast %39 : i32 to index
    %41 = memref.load %arg1[%40] : memref<4xf32, #tpu.memory_space<smem>>
    %42 = vector.extract_strided_slice %3 {offsets = [32, 0], sizes = [16, 128], strides = [1, 1]} : vector<64x128xf32> to vector<16x128xf32>
    %43 = arith.truncf %42 : vector<16x128xf32> to vector<16x128xbf16>
    %c2 = arith.constant 2 : index
    %c0_25 = arith.constant 0 : index
    %c0_26 = arith.constant 0 : index
    %44 = vector.load %arg4[%c2, %c0_25, %c0_26] : memref<4x128x64xbf16, #tpu.memory_space<vmem>>, vector<1x128x64xbf16>
    %45 = vector.shape_cast %44 : vector<1x128x64xbf16> to vector<128x64xbf16>
    %cst_27 = arith.constant dense<0.000000e+00> : vector<16x64xf32>
    %46 = tpu.matmul %43, %45, %cst_27 {dimension_numbers = #tpu.dot_dimension_numbers<[1], [0], [0], [1], [0, 0, 1, 1], [], []>} : vector<16x128xbf16>, vector<128x64xbf16>, vector<16x64xf32> -> vector<16x64xf32>
    %c2_28 = arith.constant 2 : index
    %c0_29 = arith.constant 0 : index
    %c0_30 = arith.constant 0 : index
    %47 = vector.load %arg5[%c2_28, %c0_29, %c0_30] : memref<4x16x64xf32, #tpu.memory_space<vmem>>, vector<1x16x64xf32>
    %48 = vector.shape_cast %47 : vector<1x16x64xf32> to vector<16x64xf32>
    %49 = vector.broadcast %41 : f32 to vector<16x64xf32>
    %50 = arith.mulf %49, %48 : vector<16x64xf32>
    %51 = arith.addf %46, %50 : vector<16x64xf32>
    %c2_31 = arith.constant 2 : index
    %c0_32 = arith.constant 0 : index
    %c0_33 = arith.constant 0 : index
    %52 = vector.load %arg6[%c2_31, %c0_32, %c0_33] : memref<4x16x64xf32, #tpu.memory_space<vmem>>, vector<1x16x64xf32>
    %53 = vector.shape_cast %52 : vector<1x16x64xf32> to vector<16x64xf32>
    %54 = vector.shape_cast %51 : vector<16x64xf32> to vector<1x16x64xf32>
    tpu.vector_store %arg6[%c2_31, %c0_32, %c0_33], %54 {strides = array<i32>} : memref<4x16x64xf32, #tpu.memory_space<vmem>>, vector<1x16x64xf32>,
    %c4_i32_34 = arith.constant 4 : i32
    %55 = arith.muli %arg0, %c4_i32_34 : i32
    %c3_i32 = arith.constant 3 : i32
    %56 = arith.addi %55, %c3_i32 : i32
    %57 = arith.index_cast %56 : i32 to index
    %58 = memref.load %arg1[%57] : memref<4xf32, #tpu.memory_space<smem>>
    %59 = vector.extract_strided_slice %3 {offsets = [48, 0], sizes = [16, 128], strides = [1, 1]} : vector<64x128xf32> to vector<16x128xf32>
    %60 = arith.truncf %59 : vector<16x128xf32> to vector<16x128xbf16>
    %c3 = arith.constant 3 : index
    %c0_35 = arith.constant 0 : index
    %c0_36 = arith.constant 0 : index
    %61 = vector.load %arg4[%c3, %c0_35, %c0_36] : memref<4x128x64xbf16, #tpu.memory_space<vmem>>, vector<1x128x64xbf16>
    %62 = vector.shape_cast %61 : vector<1x128x64xbf16> to vector<128x64xbf16>
    %cst_37 = arith.constant dense<0.000000e+00> : vector<16x64xf32>
    %63 = tpu.matmul %60, %62, %cst_37 {dimension_numbers = #tpu.dot_dimension_numbers<[1], [0], [0], [1], [0, 0, 1, 1], [], []>} : vector<16x128xbf16>, vector<128x64xbf16>, vector<16x64xf32> -> vector<16x64xf32>
    %c3_38 = arith.constant 3 : index
    %c0_39 = arith.constant 0 : index
    %c0_40 = arith.constant 0 : index
    %64 = vector.load %arg5[%c3_38, %c0_39, %c0_40] : memref<4x16x64xf32, #tpu.memory_space<vmem>>, vector<1x16x64xf32>
    %65 = vector.shape_cast %64 : vector<1x16x64xf32> to vector<16x64xf32>
    %66 = vector.broadcast %58 : f32 to vector<16x64xf32>
    %67 = arith.mulf %66, %65 : vector<16x64xf32>
    %68 = arith.addf %63, %67 : vector<16x64xf32>
    %c3_41 = arith.constant 3 : index
    %c0_42 = arith.constant 0 : index
    %c0_43 = arith.constant 0 : index
    %69 = vector.load %arg6[%c3_41, %c0_42, %c0_43] : memref<4x16x64xf32, #tpu.memory_space<vmem>>, vector<1x16x64xf32>
    %70 = vector.shape_cast %69 : vector<1x16x64xf32> to vector<16x64xf32>
    %71 = vector.shape_cast %68 : vector<16x64xf32> to vector<1x16x64xf32>
    tpu.vector_store %arg6[%c3_41, %c0_42, %c0_43], %71 {strides = array<i32>} : memref<4x16x64xf32, #tpu.memory_space<vmem>>, vector<1x16x64xf32>,
    return
  }
  func.func @transform_0(%arg0: i32) -> i32 {
    %c0_i32 = arith.constant 0 : i32
    %c0_i32_0 = arith.constant 0 : i32
    return %c0_i32 : i32
  }
  func.func @transform_1(%arg0: i32) -> (i32, i32) {
    %c0_i32 = arith.constant 0 : i32
    %c0_i32_0 = arith.constant 0 : i32
    %c0_i32_1 = arith.constant 0 : i32
    return %c0_i32, %c0_i32_0 : i32, i32
  }
  func.func @transform_2(%arg0: i32) -> (i32, i32, i32) {
    %c0_i32 = arith.constant 0 : i32
    %c0_i32_0 = arith.constant 0 : i32
    %c0_i32_1 = arith.constant 0 : i32
    return %arg0, %c0_i32, %c0_i32_0 : i32, i32, i32
  }
  func.func @transform_3(%arg0: i32) -> (i32, i32, i32) {
    %c0_i32 = arith.constant 0 : i32
    %c0_i32_0 = arith.constant 0 : i32
    %c0_i32_1 = arith.constant 0 : i32
    return %arg0, %c0_i32, %c0_i32_0 : i32, i32, i32
  }
  func.func @transform_4(%arg0: i32) -> (i32, i32, i32) {
    %c0_i32 = arith.constant 0 : i32
    %c0_i32_0 = arith.constant 0 : i32
    %c0_i32_1 = arith.constant 0 : i32
    return %arg0, %c0_i32, %c0_i32_0 : i32, i32, i32
  }
  func.func @transform_5(%arg0: i32) -> (i32, i32, i32) {
    %c0_i32 = arith.constant 0 : i32
    %c0_i32_0 = arith.constant 0 : i32
    %c0_i32_1 = arith.constant 0 : i32
    return %arg0, %c0_i32, %c0_i32_0 : i32, i32, i32
  }
}

</mosaic_0001>

<bundles_post_ra>
// kernel: tpu_custom_call.1
= control target key start
LH: loop header
LB: loop body
LE: loop exit
PB: predicated region body
PF: predicated region fallthrough
CT: control target
= control target key end

     0   :  { %10 = vsyncpa [#allocation4], 0  ;;  %s987_s0 = inlined_call_operand.vmem [shape: f32[4], index: 0, kind: input, shape index: {}]   ;;  %s988_s1 = inlined_call_operand.vmem [shape: bf16[32,128], index: 1, kind: input, shape index: {}]   ;;  %s989_s2 = inlined_call_operand.vmem [shape: bf16[4,16,32], index: 2, kind: input, shape index: {}]   ;;  %s990_s3 = inlined_call_operand.vmem [shape: bf16[4,128,64], index: 3, kind: input, shape index: {}]   ;;  %s991_s4 = inlined_call_operand.vmem [shape: f32[4,16,64], index: 4, kind: input, shape index: {}]   ;;  %s992_s5 = inlined_call_operand.hbm [shape: f32[4,16,64], index: 5, kind: output, shape index: {}]  }
   0x1   :  { %11 = vsyncpa [#allocation3], 0  ;;  %s17_s20 = sshll.u32 %s987_s0, 4  ;;  %s797_s21 = smov [#allocation2]   ;;  %s18_s20 = int_to_ptr.vmem [resolvable:$true] %s17_s20 }
   0x2   :  { %20 = dma.vmem_to_smem %s18_s20, 16, %s797_s21, [#allocation4]  }
   0x3   :  { %793 = dma.done.wait [#allocation4], 16  }
   0x4   :  { %794 = vsyncadd [#allocation4], 4294967280 }
   0x5   :  { %33 = sfence }
   0x6   :  { %v716_v0 = vld [vmem:[%s988_s1 + $0x8] sm:$0xff]  ;;  %v715_v1 = vld [vmem:[%s988_s1] sm:$0xff]  ;;  %vm79_vm0 = vcmask 261120   ;;  %v728_v4 = vld [vmem:[%s990_s3 + $0x38] sm:$0xff]  ;;  %s122_s15 = sld [smem:[#allocation2]]  ;;  %vm207_vm1 = vcmask 523264  }
   0x7   :  { %98 = vmatpush.bf16.msra.mxu0 %v716_v0  ;;  %v717_v2 = vld [vmem:[%s989_s2] sm:$0xff]  ;;  %v718_v3 = vld [vmem:[%s989_s2 + $0x8] sm:$0xff]  ;;  %v736_v5 = vld [vmem:[%s990_s3 + $0x78] sm:$0xff]  ;;  %193 = vmatpush.bf16.msra.mxu1 %v728_v4  ;;  %s562_s19 = sld [smem:[#allocation2 + $0x1]]  ;;  %s798_s1 = smov [#allocation5]  }
   0x8   :  { %v727_v6 = vld [vmem:[%s990_s3 + $0x30] sm:$0xff]  ;;  %284 = vmatpush.bf16.msra.mxu2 %v736_v5  ;;  %v726_v7 = vld [vmem:[%s990_s3 + $0x28] sm:$0xff]  ;;  %v725_v8 = vld [vmem:[%s990_s3 + $0x20] sm:$0xff]  ;;  %s613_s24 = sld [smem:[#allocation2 + $0x2]]  ;;  %s487_s7 = sshll.u32 %s798_s1, 4  ;;  %s488_s7 = int_to_ptr.vmem [resolvable:$true] %s487_s7 }
   0x9   :  { %v719_v9 = vld [vmem:[%s989_s2 + $0x10] sm:$0xff]  ;;  %v724_v10 = vld [vmem:[%s990_s3 + $0x18] sm:$0xff]  ;;  %v722_v14 = vld [vmem:[%s990_s3 + $0x8] sm:$0xff]  ;;  %s489_s10 = sshll.u32 %s992_s5, 4  ;;  %s799_s11 = smov 128   ;;  %s490_s10 = int_to_ptr.hbm [resolvable:$true] %s489_s10 }
   0xa   :  { %v720_v11 = vld [vmem:[%s989_s2 + $0x18] sm:$0xff]  ;;  %v723_v12 = vld [vmem:[%s990_s3 + $0x10] sm:$0xff]  ;;  %v734_v15 = vld [vmem:[%s990_s3 + $0x68] sm:$0xff]  ;;  %s664_s2 = sld [smem:[#allocation2 + $0x3]]  ;;  %s800_s12 = smov 8  }
   0xb   :  { %99 = vmatpush.bf16.msra.mxu0 %v715_v1  ;;  %194 = vmatpush.bf16.msra.mxu1 %v727_v6  ;;  %v735_v13 = vld [vmem:[%s990_s3 + $0x70] sm:$0xff]  ;;  %v721_v16 = vld [vmem:[%s990_s3] sm:$0xff]  ;;  %v732_v18 = vld [vmem:[%s990_s3 + $0x58] sm:$0xff] }
   0xc   :  { %285 = vmatpush.bf16.msra.mxu2 %v735_v13  ;;  %v733_v17 = vld [vmem:[%s990_s3 + $0x60] sm:$0xff]  ;;  %v744_v19 = vld [vmem:[%s990_s3 + $0xb8] sm:$0xff]  ;;  %v731_v20 = vld [vmem:[%s990_s3 + $0x50] sm:$0xff]  ;;  %v142_v51 = vstv %s122_s15 }
   0xd   :  { %375 = vmatpush.bf16.msra.mxu3 %v744_v19  ;;  %v743_v21 = vld [vmem:[%s990_s3 + $0xb0] sm:$0xff]  ;;  %v730_v22 = vld [vmem:[%s990_s3 + $0x48] sm:$0xff]  ;;  %v729_v24 = vld [vmem:[%s990_s3 + $0x40] sm:$0xff]  ;;  %v233_v60 = vstv %s562_s19 }
   0xe   :  { %526 = vmatmul.msk.bf16.vlgmr.msra.gmra.mxu0 %vm79_vm0, %v717_v2  ;;  %v742_v23 = vld [vmem:[%s990_s3 + $0xa8] sm:$0xff]  ;;  %v741_v25 = vld [vmem:[%s990_s3 + $0xa0] sm:$0xff]  ;;  %v740_v26 = vld [vmem:[%s990_s3 + $0x98] sm:$0xff]  ;;  %v324_v5 = vstv %s613_s24 }
   0xf   :  { %195 = vmatpush.bf16.msra.mxu1 %v726_v7  ;;  %v752_v27 = vld [vmem:[%s990_s3 + $0xf8] sm:$0xff]  ;;  %v739_v28 = vld [vmem:[%s990_s3 + $0x90] sm:$0xff]  ;;  %v738_v31 = vld [vmem:[%s990_s3 + $0x88] sm:$0xff] }
  0x10   :  { %286 = vmatpush.bf16.msra.mxu2 %v734_v15  ;;  %v751_v29 = vld [vmem:[%s990_s3 + $0xf0] sm:$0xff]  ;;  %v750_v32 = vld [vmem:[%s990_s3 + $0xe8] sm:$0xff]  ;;  %v737_v33 = vld [vmem:[%s990_s3 + $0x80] sm:$0xff] }
  0x11   :  { %376 = vmatpush.bf16.msra.mxu3 %v743_v21  ;;  %v749_v34 = vld [vmem:[%s990_s3 + $0xe0] sm:$0xff]  ;;  %v748_v37 = vld [vmem:[%s990_s3 + $0xd8] sm:$0xff]  ;;  %v747_v38 = vld [vmem:[%s990_s3 + $0xd0] sm:$0xff] }
  0x12   :  { %v746_v40 = vld [vmem:[%s990_s3 + $0xc8] sm:$0xff]  ;;  %v745_v41 = vld [vmem:[%s990_s3 + $0xc0] sm:$0xff]  ;;  %v579_v59 = vld [vmem:[%s991_s4 + $0x10] sm:$0xff] }
  0x13   :  { %196 = vmatpush.bf16.msra.mxu1 %v725_v8  ;;  %v140_v50 = vld [vmem:[%s991_s4] sm:$0xff]  ;;  %v141_v55 = vld [vmem:[%s991_s4 + $0x8] sm:$0xff]  ;;  %v234_v61 = vmul.f32 %v579_v59, %v233_v60  ;;  %v580_v0 = vld [vmem:[%s991_s4 + $0x18] sm:$0xff] }
  0x14   :  { %287 = vmatpush.bf16.msra.mxu2 %v733_v17  ;;  %v143_v52 = vmul.f32 %v142_v51, %v140_v50  ;;  %v144_v56 = vmul.f32 %v142_v51, %v141_v55  ;;  %v235_v1 = vmul.f32 %v580_v0, %v233_v60  ;;  %v630_v4 = vld [vmem:[%s991_s4 + $0x20] sm:$0xff] }
  0x15   :  { %377 = vmatpush.bf16.msra.mxu3 %v742_v23  ;;  %v325_v6 = vmul.f32 %v630_v4, %v324_v5 }
  0x17   :  { %197 = vmatpush.bf16.msra.mxu1 %v724_v10  ;;  %v681_v10 = vld [vmem:[%s991_s4 + $0x30] sm:$0xff] }
  0x18   :  { %288 = vmatpush.bf16.msra.mxu2 %v732_v18  ;;  %v682_v18 = vld [vmem:[%s991_s4 + $0x38] sm:$0xff] }
  0x19   :  { %378 = vmatpush.bf16.msra.mxu3 %v741_v25 }
  0x1b   :  { %198 = vmatpush.bf16.msra.mxu1 %v723_v12 }
  0x1c   :  { %289 = vmatpush.bf16.msra.mxu2 %v731_v20 }
  0x1d   :  { %379 = vmatpush.bf16.msra.mxu3 %v740_v26 }
  0x1e   :  { %527 = vmatmul.msk.bf16.gmra.mxu0 %vm79_vm0, %v718_v3 }
  0x1f   :  { %199 = vmatpush.bf16.msra.mxu1 %v722_v14 }
  0x20   :  { %290 = vmatpush.bf16.msra.mxu2 %v730_v22 }
  0x21   :  { %380 = vmatpush.bf16.msra.mxu3 %v739_v28 }
  0x23   :  { %200 = vmatpush.bf16.msra.mxu1 %v721_v16 }
  0x24   :  { %291 = vmatpush.bf16.msra.mxu2 %v729_v24 }
  0x25   :  { %381 = vmatpush.bf16.msra.mxu3 %v738_v31 }
  0x27   :  { %466 = vmatpush.bf16.msrb.mxu1 %v752_v27 }
  0x29   :  { %382 = vmatpush.bf16.msra.mxu3 %v737_v33 }
  0x2b   :  { %467 = vmatpush.bf16.msrb.mxu1 %v751_v29 }
  0x2e   :  { %528 = vmatmul.msk.bf16.gmra.mxu0 %vm79_vm0, %v719_v9  ;;  %v631_v9 = vld [vmem:[%s991_s4 + $0x28] sm:$0xff] }
  0x2f   :  { %468 = vmatpush.bf16.msrb.mxu1 %v750_v32  ;;  %v326_v12 = vmul.f32 %v631_v9, %v324_v5 }
  0x33   :  { %469 = vmatpush.bf16.msrb.mxu1 %v749_v34 }
  0x37   :  { %470 = vmatpush.bf16.msrb.mxu1 %v748_v37 }
  0x3b   :  { %471 = vmatpush.bf16.msrb.mxu1 %v747_v38 }
  0x3e   :  { %529 = vmatmul.msk.bf16.gmra.mxu0 %vm79_vm0, %v720_v11  ;;  %v415_v11 = vstv %s664_s2 }
  0x3f   :  { %472 = vmatpush.bf16.msrb.mxu1 %v746_v40  ;;  %v416_v13 = vmul.f32 %v681_v10, %v415_v11  ;;  %v417_v19 = vmul.f32 %v682_v18, %v415_v11 }
  0x43   :  { %473 = vmatpush.bf16.msrb.mxu1 %v745_v41 }
  0x8b   :  { %v101_v30 = vpop.f32.mrf.mxu0 }
  0x93   :  { %v103_v35 = vpop.f32.mrf.mxu0 }
  0x94   :  { %v123_v36 = vpack.c.bf16 %v103_v35, %v101_v30 }
  0x96   :  { %201 = vmatmul.bf16.vlgmr.msra.gmra.mxu1 %v123_v36 }
  0x9b   :  { %v106_v39 = vpop.f32.mrf.mxu0 }
  0xa3   :  { %v108_v42 = vpop.f32.mrf.mxu0 }
  0xa4   :  { %v212_v43 = vpack.c.bf16 %v108_v42, %v106_v39 }
  0xa6   :  { %292 = vmatmul.bf16.vlgmr.msra.gmra.mxu2 %v212_v43 }
  0xab   :  { %v111_v44 = vpop.f32.mrf.mxu0 }
  0xb3   :  { %v113_v45 = vpop.f32.mrf.mxu0 }
  0xb4   :  { %v303_v46 = vpack.c.bf16 %v113_v45, %v111_v44 }
  0xb6   :  { %383 = vmatmul.bf16.vlgmr.msra.gmra.mxu3 %v303_v46 }
  0xbb   :  { %v116_v47 = vpop.f32.mrf.mxu0 }
  0xc3   :  { %v118_v48 = vpop.f32.mrf.mxu0 }
  0xc4   :  { %v394_v49 = vpack.c.bf16 %v118_v48, %v116_v47 }
  0xc6   :  { %474 = vmatmul.bf16.vlgmr.msrb.gmra.mxu1 %v394_v49 }
 0x113   :  { %v202_v53 = vpop.f32.mrf.mxu1 }
 0x114   :  { %v203_v54 = vadd.f32 %v202_v53, %v143_v52 }
 0x116   :  { %208 = vst.msk [vmem:[#allocation5] sm:$0xff] %vm207_vm1, %v203_v54 }
 0x11b   :  { %v204_v57 = vpop.f32.mrf.mxu1 }
 0x11c   :  { %v205_v58 = vadd.f32 %v204_v57, %v144_v56 }
 0x11e   :  { %209 = vst.msk [vmem:[#allocation5 + $0x8] sm:$0xff] %vm207_vm1, %v205_v58 }
 0x129   :  { %v293_v62 = vpop.f32.mrf.mxu2 }
 0x12a   :  { %v294_v63 = vadd.f32 %v293_v62, %v234_v61 }
 0x12c   :  { %299 = vst.msk [vmem:[#allocation5 + $0x10] sm:$0xff] %vm207_vm1, %v294_v63 }
 0x131   :  { %v295_v2 = vpop.f32.mrf.mxu2 }
 0x132   :  { %v296_v3 = vadd.f32 %v295_v2, %v235_v1 }
 0x134   :  { %300 = vst.msk [vmem:[#allocation5 + $0x18] sm:$0xff] %vm207_vm1, %v296_v3 }
 0x139   :  { %v384_v7 = vpop.f32.mrf.mxu3 }
 0x13a   :  { %v385_v8 = vadd.f32 %v384_v7, %v325_v6 }
 0x13c   :  { %390 = vst.msk [vmem:[#allocation5 + $0x20] sm:$0xff] %vm207_vm1, %v385_v8 }
 0x141   :  { %v386_v14 = vpop.f32.mrf.mxu3 }
 0x142   :  { %v387_v15 = vadd.f32 %v386_v14, %v326_v12 }
 0x143   :  { %v475_v16 = vpop.f32.mrf.mxu1 }
 0x144   :  { %391 = vst.msk [vmem:[#allocation5 + $0x28] sm:$0xff] %vm207_vm1, %v387_v15  ;;  %v476_v17 = vadd.f32 %v475_v16, %v416_v13 }
 0x146   :  { %481 = vst.msk [vmem:[#allocation5 + $0x30] sm:$0xff] %vm207_vm1, %v476_v17 }
 0x14b   :  { %v477_v20 = vpop.f32.mrf.mxu1 }
 0x14c   :  { %v478_v21 = vadd.f32 %v477_v20, %v417_v19 }
 0x14e   :  { %482 = vst.msk [vmem:[#allocation5 + $0x38] sm:$0xff] %vm207_vm1, %v478_v21 }
 0x14f   :  { %495 = dma.vmem_to_hbm [thread:$0]  %s488_s7, 1024, %s490_s10, [#allocation3], %s799_s11, %s799_s11, %s800_s12  }
 0x150   :  { %795 = dma.done.wait [#allocation3], 1024  }
 0x151   :  { %796 = vsyncadd [#allocation3], 4294966272 }
 0x152   :  { %500 = vsyncpa [#allocation3], 1 }
 0x153   :  { %501 = vsyncpa [#allocation4], 1 }

</bundles_post_ra>
